<compile_context>
chip_gen: v7x
topology: tpu7x:2x2x1
jax: 0.10.0
libtpu: 0.0.40
codegen_flags: <defaults>
</compile_context>

<pallas_src>
import math
from functools import partial

import jax
import jax.numpy as jnp
from jax import lax
from jax.experimental import pallas as pl
from jax.experimental.pallas import tpu as pltpu

_LANE = 128


def _round_up(x, m):
    return ((x + m - 1) // m) * m


def _choose_tile(dim_pad, preferred=(512, 256, 128)):
    """Pick the largest preferred tile that divides the padded dim."""
    for t in preferred:
        if dim_pad % t == 0:
            return t
    return dim_pad


def _pad2d(a, rows, cols):
    r, c = a.shape
    return jnp.pad(a, ((0, rows - r), (0, cols - c)))


# --------------------------------------------------------------------------
# Kernel 1: pairwise Euclidean distance matrix (Eu_dis), 2-D output tiling
# --------------------------------------------------------------------------
def _eu_dis_kernel(xi_ref, xjt_ref, d_ref, *, mxu_dtype):
    xi = xi_ref[...]                                      # (TM, D) f32
    xjt = xjt_ref[...]                                    # (D, TN) f32
    aa_i = jnp.sum(xi * xi, axis=1, keepdims=True)        # (TM, 1)  f32 norms
    aa_j = jnp.sum(xjt * xjt, axis=0, keepdims=True)      # (1, TN)  f32 norms
    ab = jnp.dot(xi.astype(mxu_dtype), xjt.astype(mxu_dtype),
                 preferred_element_type=jnp.float32)      # MXU cross term
    d2 = jnp.maximum(aa_i + aa_j - 2.0 * ab, 0.0)
    # Note: the reference's maximum(dist, dist.T) is only an FP-symmetry fix;
    # tiles (i,j) and (j,i) are computed from identical data here, so it is dropped.
    d_ref[...] = jnp.sqrt(d2)


def eu_dis(x_pad, *, mxu_dtype=jnp.bfloat16):
    n_pad, d_pad = x_pad.shape
    tm = _choose_tile(n_pad)
    tn = tm
    xt_pad = x_pad.T                                      # pre-transposed RHS
    kernel = partial(_eu_dis_kernel, mxu_dtype=mxu_dtype)
    return pl.pallas_call(
        kernel,
        grid=(n_pad // tm, n_pad // tn),
        in_specs=[
            pl.BlockSpec((tm, d_pad), lambda i, j: (i, 0)),
            pl.BlockSpec((d_pad, tn), lambda i, j: (0, j)),
        ],
        out_specs=pl.BlockSpec((tm, tn), lambda i, j: (i, j)),
        out_shape=jax.ShapeDtypeStruct((n_pad, n_pad), jnp.float32),
        compiler_params=pltpu.CompilerParams(
            dimension_semantics=("parallel", "parallel")),
    )(x_pad, xt_pad)


# --------------------------------------------------------------------------
# Kernel 2: G = DV^-1/2 H DE^-1 H^T DV^-1/2  as a tiled (i,j,k) matmul
#           Hs = H * DE^-1/2 (scaled once in the wrapper); G = dv2 (Hs Hs^T) dv2
# --------------------------------------------------------------------------
def _g_kernel(hs_ref, hst_ref, dvi_ref, dvj_ref, g_ref, acc_ref, *, mxu_dtype):
    @pl.when(pl.program_id(2) == 0)
    def _():
        acc_ref[...] = jnp.zeros_like(acc_ref)

    acc_ref[...] += jnp.dot(hs_ref[...].astype(mxu_dtype),
                            hst_ref[...].astype(mxu_dtype),
                            preferred_element_type=jnp.float32)

    @pl.when(pl.program_id(2) == pl.num_programs(2) - 1)
    def _():
        g_ref[...] = acc_ref[...] * dvi_ref[...] * dvj_ref[...]


def generate_G_from_H(H, *, mxu_dtype=jnp.bfloat16):
    """Returns the padded (N_pad, N_pad) G; padded rows/cols are exactly zero."""
    n, e = H.shape
    n_pad = _round_up(n, _LANE)
    e_pad = _round_up(e, _LANE)
    H_pad = _pad2d(H.astype(jnp.float32), n_pad, e_pad)

    dv = jnp.sum(H_pad, axis=1)                           # vertex degree (W = I)
    de = jnp.sum(H_pad, axis=0)                           # hyperedge degree
    dv2 = jnp.where(dv > 0, lax.rsqrt(dv), 0.0)           # DV^-1/2 (zero-deg guard)
    de2 = jnp.where(de > 0, lax.rsqrt(de), 0.0)           # DE^-1/2 (zero-deg guard)

    Hs = H_pad * de2[None, :]                             # scale H once
    HsT = Hs.T                                            # pre-transposed RHS
    dv2_col = dv2.reshape(n_pad, 1)
    dv2_row = dv2.reshape(1, n_pad)

    tm = _choose_tile(n_pad)
    tn = tm
    tk = _choose_tile(e_pad)

    kernel = partial(_g_kernel, mxu_dtype=mxu_dtype)
    g_pad = pl.pallas_call(
        kernel,
        grid=(n_pad // tm, n_pad // tn, e_pad // tk),
        in_specs=[
            pl.BlockSpec((tm, tk), lambda i, j, k: (i, k)),
            pl.BlockSpec((tk, tn), lambda i, j, k: (k, j)),
            pl.BlockSpec((tm, 1), lambda i, j, k: (i, 0)),
            pl.BlockSpec((1, tn), lambda i, j, k: (0, j)),
        ],
        out_specs=pl.BlockSpec((tm, tn), lambda i, j, k: (i, j)),
        out_shape=jax.ShapeDtypeStruct((n_pad, n_pad), jnp.float32),
        scratch_shapes=[pltpu.VMEM((tm, tn), jnp.float32)],
        compiler_params=pltpu.CompilerParams(
            dimension_semantics=("parallel", "parallel", "arbitrary")),
    )(Hs, HsT, dv2_col, dv2_row)
    return g_pad


# --------------------------------------------------------------------------
# Kernel 3: single_layer_HGNN_conv  out = G @ (x @ W^T + b)
#   3a) y = x @ W^T + b  (row-tiled, W pre-transposed in the wrapper)
#   3b) out = G @ y      (row-tiled over G with k-accumulation: G is streamed)
# --------------------------------------------------------------------------
def _linear_kernel(x_ref, wt_ref, b_ref, y_ref, *, mxu_dtype):
    y = jnp.dot(x_ref[...].astype(mxu_dtype), wt_ref[...].astype(mxu_dtype),
                preferred_element_type=jnp.float32)
    y_ref[...] = y + b_ref[...]


def _gy_kernel(g_ref, y_ref, o_ref, acc_ref, *, mxu_dtype):
    @pl.when(pl.program_id(1) == 0)
    def _():
        acc_ref[...] = jnp.zeros_like(acc_ref)

    acc_ref[...] += jnp.dot(g_ref[...].astype(mxu_dtype),
                            y_ref[...].astype(mxu_dtype),
                            preferred_element_type=jnp.float32)

    @pl.when(pl.program_id(1) == pl.num_programs(1) - 1)
    def _():
        o_ref[...] = acc_ref[...].astype(o_ref.dtype)


def hgnn_conv(x_pad, g_pad, wT_pad, b_pad, *, mxu_dtype=jnp.bfloat16):
    n_pad, din_pad = x_pad.shape
    dout_pad = wT_pad.shape[1]
    tm = _choose_tile(n_pad)
    tk = tm

    lin = partial(_linear_kernel, mxu_dtype=mxu_dtype)
    y_pad = pl.pallas_call(
        lin,
        grid=(n_pad // tm,),
        in_specs=[
            pl.BlockSpec((tm, din_pad), lambda i: (i, 0)),
            pl.BlockSpec((din_pad, dout_pad), lambda i: (0, 0)),
            pl.BlockSpec((1, dout_pad), lambda i: (0, 0)),
        ],
        out_specs=pl.BlockSpec((tm, dout_pad), lambda i: (i, 0)),
        out_shape=jax.ShapeDtypeStruct((n_pad, dout_pad), jnp.float32),
        compiler_params=pltpu.CompilerParams(
            dimension_semantics=("parallel",)),
    )(x_pad, wT_pad, b_pad)

    gy = partial(_gy_kernel, mxu_dtype=mxu_dtype)
    out_pad = pl.pallas_call(
        gy,
        grid=(n_pad // tm, n_pad // tk),
        in_specs=[
            pl.BlockSpec((tm, tk), lambda i, k: (i, k)),
            pl.BlockSpec((tk, dout_pad), lambda i, k: (k, 0)),
        ],
        out_specs=pl.BlockSpec((tm, dout_pad), lambda i, k: (i, 0)),
        out_shape=jax.ShapeDtypeStruct((n_pad, dout_pad), jnp.float32),
        scratch_shapes=[pltpu.VMEM((tm, dout_pad), jnp.float32)],
        compiler_params=pltpu.CompilerParams(
            dimension_semantics=("parallel", "arbitrary")),
    )(g_pad, y_pad)
    return out_pad


# --------------------------------------------------------------------------
# Glue: KNN hyperedge construction (runs under no_grad in the reference).
# TODO(synk): the per-row top-k selection + data-dependent scatter building H has
# no clean Pallas equivalent; it stays in plain JAX (lax.top_k replaces argsort).
# --------------------------------------------------------------------------
def construct_H_with_KNN_from_distance(dis_mat, k_neig, is_probH=True, m_prob=1.0):
    n = dis_mat.shape[0]
    dis = dis_mat * (1.0 - jnp.eye(n, dtype=dis_mat.dtype))      # zero the diagonal
    avg_dis = jnp.mean(dis, axis=1)                              # per-center mean
    _, nearest = lax.top_k(-dis, k_neig)                         # k smallest distances
    centers = jnp.arange(n)
    has_center = jnp.any(nearest == centers[:, None], axis=1)
    nearest = nearest.at[:, k_neig - 1].set(
        jnp.where(has_center, nearest[:, k_neig - 1], centers))  # force center in
    d_sel = jnp.take_along_axis(dis, nearest, axis=1)            # (n, k)
    if is_probH:
        vals = jnp.exp(-(d_sel ** 2) / (m_prob * avg_dis[:, None]) ** 2)
    else:
        vals = jnp.ones_like(d_sel)
    H = jnp.zeros((n, n), dtype=jnp.float32)
    H = H.at[nearest, centers[:, None]].set(vals.astype(jnp.float32))
    return H


# --------------------------------------------------------------------------
# HyperGraph module (num_layer=1 -> single_layer_HGNN_conv, emb_dim x emb_dim)
# --------------------------------------------------------------------------
class HyperGraphPallas:
    def __init__(self, emb_dim=256, K_neigs=(3,), num_layer=1, key=None,
                 mxu_dtype=jnp.bfloat16):
        assert num_layer == 1, "only single_layer_HGNN_conv (num_layer=1) implemented"
        self.K_neigs = list(K_neigs) if isinstance(K_neigs, (list, tuple)) else [K_neigs]
        self.emb_dim = emb_dim
        self.mxu_dtype = mxu_dtype
        # reset_parameters(): weight ~ Normal(0, 1/sqrt(in_ft)), bias = 0
        stdv = 1.0 / math.sqrt(emb_dim)
        self.weight = stdv * jax.random.normal(key, (emb_dim, emb_dim), jnp.float32)
        self.bias = jnp.zeros((emb_dim,), jnp.float32)

    def __call__(self, node_feat):
        x = node_feat[0].astype(jnp.float32)                     # (N, emb_dim)
        n, d = x.shape
        n_pad = _round_up(n, _LANE)
        d_pad = _round_up(d, _LANE)
        x_pad = _pad2d(x, n_pad, d_pad)

        # 1) distance matrix (Pallas) --------------------------------------
        dis_full = eu_dis(x_pad, mxu_dtype=self.mxu_dtype)
        dis = dis_full[:n, :n]

        # 2) KNN hyperedge construction (plain JAX) + hyperedge_concat -----
        H = None
        for k in self.K_neigs:
            H_tmp = construct_H_with_KNN_from_distance(dis, k)
            H = H_tmp if H is None else jnp.hstack((H, H_tmp))

        # 3) G from H (Pallas) ---------------------------------------------
        g_pad = generate_G_from_H(H, mxu_dtype=self.mxu_dtype)

        # 4) single_layer_HGNN_conv (Pallas) --------------------------------
        dout = self.weight.shape[0]
        dout_pad = _round_up(dout, _LANE)
        wT_pad = _pad2d(self.weight.T, d_pad, dout_pad)          # (in_ft, out_ft), padded
        b_pad = _pad2d(self.bias.reshape(1, dout), 1, dout_pad)
        out_pad = hgnn_conv(x_pad, g_pad, wT_pad, b_pad, mxu_dtype=self.mxu_dtype)
        out = out_pad[:n, :dout]
        return out, H


if __name__ == "__main__":
    key = jax.random.PRNGKey(0)
    k_feat, k_param = jax.random.split(key)

    N, emb_dim = 16, 128                                         # small test shapes
    x = jax.random.normal(k_feat, (N, emb_dim), dtype=jnp.float32)

    model = HyperGraphPallas(emb_dim=emb_dim, K_neigs=[3], num_layer=1, key=k_param)
    out, H = model([x])
    out = jax.block_until_ready(out)
    H = jax.block_until_ready(H)

    assert out.shape == (N, emb_dim), out.shape
    assert H.shape == (N, N), H.shape
    assert bool(jnp.all(jnp.isfinite(out))) and bool(jnp.all(jnp.isfinite(H)))

    # --- numeric spot checks vs pure-JAX f32 references (loose: bf16 MXU) ---
    off_diag = 1.0 - jnp.eye(N, dtype=jnp.float32)

    aa = jnp.sum(x * x, axis=1, keepdims=True)
    dis_ref = jnp.sqrt(jnp.maximum(aa + aa.T - 2.0 * (x @ x.T), 0.0))
    dis_ker = eu_dis(_pad2d(x, _round_up(N, _LANE), _round_up(emb_dim, _LANE)))[:N, :N]
    # diagonal is zeroed before use downstream; compare only the used entries
    assert bool(jnp.allclose(dis_ker * off_diag, dis_ref * off_diag,
                             atol=5e-2, rtol=5e-2))

    dv = jnp.sum(H, axis=1)
    de = jnp.sum(H, axis=0)
    dv2 = jnp.where(dv > 0, dv ** -0.5, 0.0)
    inv_de = jnp.where(de > 0, 1.0 / de, 0.0)
    G_ref = (dv2[:, None] * H) @ jnp.diag(inv_de) @ (H.T * dv2[None, :])
    G_ker = generate_G_from_H(H)[:N, :N]
    assert bool(jnp.allclose(G_ker, G_ref, atol=5e-2, rtol=5e-2))

    out_ref = G_ker @ (x @ model.weight.T + model.bias)          # isolates conv-kernel error
    assert bool(jnp.allclose(out, out_ref, atol=1e-1, rtol=5e-2))

    print("KERNEL_OK")
</pallas_src>

<mosaic_0001>
module attributes {stable_mosaic.version = 11 : i64} {
  func.func @_eu_dis_kernel(%arg0: i32, %arg1: i32, %arg2: memref<128x128xf32, #tpu.memory_space<vmem>>, %arg3: memref<128x128xf32, #tpu.memory_space<vmem>>, %arg4: memref<128x128xf32, #tpu.memory_space<vmem>>) attributes {dimension_semantics = [#tpu.dimension_semantics<parallel>, #tpu.dimension_semantics<parallel>], iteration_bounds = array<i64: 1, 1>, scalar_prefetch = 0 : i64, scratch_operands = 0 : i64, tpu.core_type = #tpu.core_type<tc>, window_params = [{transform_indices = @transform_0, window_bounds = array<i64: 128, 128>}, {transform_indices = @transform_1, window_bounds = array<i64: 128, 128>}, {transform_indices = @transform_2, window_bounds = array<i64: 128, 128>}]} {
    %c0 = arith.constant 0 : index
    %c0_0 = arith.constant 0 : index
    %0 = vector.load %arg2[%c0, %c0_0] : memref<128x128xf32, #tpu.memory_space<vmem>>, vector<128x128xf32>
    %c0_1 = arith.constant 0 : index
    %c0_2 = arith.constant 0 : index
    %1 = vector.load %arg3[%c0_1, %c0_2] : memref<128x128xf32, #tpu.memory_space<vmem>>, vector<128x128xf32>
    %2 = arith.mulf %0, %0 : vector<128x128xf32>
    %cst = arith.constant dense<0.000000e+00> : vector<128xf32>
    %3 = vector.multi_reduction <add>, %2, %cst [1] : vector<128x128xf32> to vector<128xf32>
    %4 = vector.shape_cast %3 : vector<128xf32> to vector<128x1xf32>
    %5 = arith.mulf %1, %1 : vector<128x128xf32>
    %cst_3 = arith.constant dense<0.000000e+00> : vector<128xf32>
    %6 = vector.multi_reduction <add>, %5, %cst_3 [0] : vector<128x128xf32> to vector<128xf32>
    %7 = vector.shape_cast %6 : vector<128xf32> to vector<1x128xf32>
    %8 = arith.truncf %0 : vector<128x128xf32> to vector<128x128xbf16>
    %9 = arith.truncf %1 : vector<128x128xf32> to vector<128x128xbf16>
    %cst_4 = arith.constant dense<0.000000e+00> : vector<128x128xf32>
    %10 = tpu.matmul %8, %9, %cst_4 {dimension_numbers = #tpu.dot_dimension_numbers<[1], [0], [0], [1], [0, 0, 1, 1], [], []>} : vector<128x128xbf16>, vector<128x128xbf16>, vector<128x128xf32> -> vector<128x128xf32>
    %11 = vector.broadcast %4 : vector<128x1xf32> to vector<128x128xf32>
    %12 = vector.broadcast %7 : vector<1x128xf32> to vector<128x128xf32>
    %13 = arith.addf %11, %12 : vector<128x128xf32>
    %cst_5 = arith.constant 2.000000e+00 : f32
    %14 = vector.broadcast %cst_5 : f32 to vector<128x128xf32>
    %15 = arith.mulf %14, %10 : vector<128x128xf32>
    %16 = arith.subf %13, %15 : vector<128x128xf32>
    %cst_6 = arith.constant 0.000000e+00 : f32
    %17 = vector.broadcast %cst_6 : f32 to vector<128x128xf32>
    %18 = arith.maximumf %16, %17 : vector<128x128xf32>
    %19 = math.sqrt %18 : vector<128x128xf32>
    %c0_7 = arith.constant 0 : index
    %c0_8 = arith.constant 0 : index
    %20 = vector.load %arg4[%c0_7, %c0_8] : memref<128x128xf32, #tpu.memory_space<vmem>>, vector<128x128xf32>
    tpu.vector_store %arg4[%c0_7, %c0_8], %19 {strides = array<i32>} : memref<128x128xf32, #tpu.memory_space<vmem>>, vector<128x128xf32>,
    return
  }
  func.func @transform_0(%arg0: i32, %arg1: i32) -> (i32, i32) {
    %c0_i32 = arith.constant 0 : i32
    %c0_i32_0 = arith.constant 0 : i32
    return %arg0, %c0_i32 : i32, i32
  }
  func.func @transform_1(%arg0: i32, %arg1: i32) -> (i32, i32) {
    %c0_i32 = arith.constant 0 : i32
    %c0_i32_0 = arith.constant 0 : i32
    return %c0_i32, %arg1 : i32, i32
  }
  func.func @transform_2(%arg0: i32, %arg1: i32) -> (i32, i32) {
    %c0_i32 = arith.constant 0 : i32
    return %arg0, %arg1 : i32, i32
  }
}

</mosaic_0001>

<bundles_post_ra>
// kernel: tpu_custom_call.1
= control target key start
LH: loop header
LB: loop body
LE: loop exit
PB: predicated region body
PF: predicated region fallthrough
CT: control target
= control target key end

     0   :  { %7 = vsyncpa [#allocation3], 0  ;;  %s897_s0 = inlined_call_operand.hbm [shape: f32[128,128], index: 0, kind: input, shape index: {}]   ;;  %s898_s1 = inlined_call_operand.hbm [shape: f32[128,128], index: 1, kind: input, shape index: {}]   ;;  %s899_s2 = inlined_call_operand.hbm [shape: f32[128,128], index: 2, kind: output, shape index: {}]  }
   0x1   :  { %8 = vsyncpa [#allocation6], 0 }
   0x2   :  { %9 = vsyncpa [#allocation4], 0  ;;  %s654_s9 = smov [#allocation2]   ;;  %s582_s13 = scalar_lea.hbm %s897_s0, 2048 }
   0x3   :  { %s15_s10 = sshll.u32 %s654_s9, 4  ;;  %p583_p0 = scmp.ne.s32.totalorder %s897_s0, %s582_s13  ;;  %s16_s10 = int_to_ptr.vmem [resolvable:$true] %s15_s10 }
   0x4   :  { %p586_p1 = scmp.lt.u32.totalorder %s582_s13, %s897_s0 }
   0x6   :  { %p588_p2 = pnand %p586_p1, %p583_p0 }
   0x8   :  { %591 = shalt.err (!%p588_p2)
}
   0x9   :  { %s592_s18 = scalar_lea.vmem %s16_s10, 2048  ;;  %p597_p4 = scmp.lt.s32.totalorder %s16_s10, %s16_s10 }
   0xa   :  { %p593_p3 = scmp.ne.s32.totalorder %s16_s10, %s592_s18  ;;  %p598_p5 = scmp.lt.s32.totalorder %s592_s18, %s592_s18 }
   0xc   :  { %p599_p6 = por %p598_p5, %p597_p4 }
   0xe   :  { %p600_p7 = pnand %p599_p6, %p593_p3 }
  0x10   :  { %603 = shalt.err (!%p600_p7)
}
  0x11   :  { %s655_s19 = smov 128   ;;  %s656_s20 = smov 8  }
  0x12   :  { %21 = dma.hbm_to_vmem [thread:$0]  %s897_s0, 2048, %s16_s10, [#allocation3], %s655_s19, %s655_s19, %s656_s20  }
  0x13   :  { %s657_s23 = smov [#allocation5]   ;;  %s604_s27 = scalar_lea.hbm %s898_s1, 2048 }
  0x14   :  { %s27_s24 = sshll.u32 %s657_s23, 4  ;;  %p605_p8 = scmp.ne.s32.totalorder %s898_s1, %s604_s27  ;;  %s28_s24 = int_to_ptr.vmem [resolvable:$true] %s27_s24 }
  0x15   :  { %p608_p9 = scmp.lt.u32.totalorder %s604_s27, %s898_s1 }
  0x17   :  { %p610_p10 = pnand %p608_p9, %p605_p8 }
  0x19   :  { %613 = shalt.err (!%p610_p10)
}
  0x1a   :  { %s614_s4 = scalar_lea.vmem %s28_s24, 2048  ;;  %p619_p12 = scmp.lt.s32.totalorder %s28_s24, %s28_s24 }
  0x1b   :  { %p615_p11 = scmp.ne.s32.totalorder %s28_s24, %s614_s4  ;;  %p620_p13 = scmp.lt.s32.totalorder %s614_s4, %s614_s4 }
  0x1d   :  { %p621_p0 = por %p620_p13, %p619_p12 }
  0x1f   :  { %p622_p1 = pnand %p621_p0, %p615_p11 }
  0x21   :  { %625 = shalt.err (!%p622_p1)
}
  0x22   :  { %33 = dma.hbm_to_vmem [thread:$0]  %s898_s1, 2048, %s28_s24, [#allocation6], %s655_s19, %s655_s19, %s656_s20  }
  0x23   :  { %648 = dma.done.wait [#allocation3], 2048  }
  0x24   :  { %649 = vsyncadd [#allocation3], 4294965248 }
  0x25   :  { %650 = dma.done.wait [#allocation6], 2048  }
  0x26   :  { %651 = vsyncadd [#allocation6], 4294965248  ;;  %v57_v0 = vld [vmem:[#allocation5] sm:$0xff]  ;;  %v58_v1 = vld [vmem:[#allocation5 + $0x8] sm:$0xff]  ;;  %s658_s1 = smov [#allocation7]  }
  0x27   :  { %v59_v2 = vld [vmem:[#allocation5 + $0x10] sm:$0xff]  ;;  %v121_v3 = vmul.f32 %v57_v0, %v57_v0  ;;  %v122_v4 = vmul.f32 %v58_v1, %v58_v1  ;;  %v166_v5 = vpack.c.bf16 %v58_v1, %v57_v0  ;;  %v60_v6 = vld [vmem:[#allocation5 + $0x18] sm:$0xff]  ;;  %v61_v9 = vld [vmem:[#allocation5 + $0x20] sm:$0xff]  ;;  %s468_s6 = sshll.u32 %s658_s1, 4  ;;  %s469_s6 = int_to_ptr.vmem [resolvable:$true] %s468_s6 }
  0x28   :  { %v123_v7 = vmul.f32 %v59_v2, %v59_v2  ;;  %v167_v8 = vpack.c.bf16 %v60_v6, %v59_v2  ;;  %v62_v10 = vld [vmem:[#allocation5 + $0x28] sm:$0xff]  ;;  %v124_v12 = vmul.f32 %v60_v6, %v60_v6  ;;  %v125_v14 = vmul.f32 %v61_v9, %v61_v9  ;;  %v63_v16 = vld [vmem:[#allocation5 + $0x30] sm:$0xff]  ;;  %v41_v17 = vld [vmem:[#allocation2] sm:$0xff]  ;;  %s626_s7 = scalar_lea.vmem %s469_s6, 2048  ;;  %p631_p3 = scmp.lt.s32.totalorder %s469_s6, %s469_s6 }
  0x29   :  { %v137_v11 = vadd.f32 %v122_v4, %v121_v3  ;;  %497 = vmatprep.subr.bf16.mxu0 %v166_v5  ;;  %529 = vmatprep.subr.bf16.mxu1 %v166_v5  ;;  %v168_v15 = vpack.c.bf16 %v62_v10, %v61_v9  ;;  %v42_v18 = vld [vmem:[#allocation2 + $0x8] sm:$0xff]  ;;  %v64_v19 = vld [vmem:[#allocation5 + $0x38] sm:$0xff]  ;;  %v704_v20 = vld [vmem:[#allocation2 + $0x40] sm:$0xff]  ;;  %v126_v23 = vmul.f32 %v62_v10, %v62_v10  ;;  %p627_p2 = scmp.ne.s32.totalorder %s469_s6, %s626_s7  ;;  %p632_p4 = scmp.lt.s32.totalorder %s626_s7, %s626_s7 }
  0x2a   :  { %498 = vmatpush3.bf16.msra.mxu0 %v166_v5  ;;  %537 = vmatpush3.bf16.msra.mxu1 %v166_v5  ;;  %v706_v21 = vld [vmem:[#allocation2 + $0x48] sm:$0xff]  ;;  %v127_v24 = vmul.f32 %v63_v16, %v63_v16  ;;  %v158_v25 = vpack.c.bf16 %v42_v18, %v41_v17  ;;  %v169_v27 = vpack.c.bf16 %v64_v19, %v63_v16  ;;  %v65_v29 = vld [vmem:[#allocation5 + $0x40] sm:$0xff]  ;;  %v710_v31 = vld [vmem:[#allocation2 + $0x10] sm:$0xff] }
  0x2b   :  { %v138_v13 = vadd.f32 %v137_v11, %v123_v7  ;;  %499 = vmatprep.subr.bf16.mxu0 %v167_v8  ;;  %530 = vmatprep.subr.bf16.mxu1 %v167_v8  ;;  %v162_v28 = vpack.c.bf16 %v706_v21, %v704_v20  ;;  %v66_v30 = vld [vmem:[#allocation5 + $0x48] sm:$0xff]  ;;  %v128_v33 = vmul.f32 %v64_v19, %v64_v19  ;;  %v714_v39 = vld [vmem:[#allocation2 + $0x18] sm:$0xff]  ;;  %v67_v40 = vld [vmem:[#allocation5 + $0x50] sm:$0xff]  ;;  %p633_p5 = por %p632_p4, %p631_p3 }
  0x2c   :  { %513 = vmatprep.mubr.bf16.mxu0 %v158_v25  ;;  %v73_v34 = vmul.f32 %v41_v17, %v41_v17  ;;  %v75_v35 = vmul.f32 %v710_v31, %v710_v31  ;;  %v129_v37 = vmul.f32 %v65_v29, %v65_v29  ;;  %v170_v38 = vpack.c.bf16 %v66_v30, %v65_v29  ;;  %v68_v41 = vld [vmem:[#allocation5 + $0x58] sm:$0xff]  ;;  %v718_v49 = vld [vmem:[#allocation2 + $0x20] sm:$0xff]  ;;  %v720_v50 = vld [vmem:[#allocation2 + $0x28] sm:$0xff] }
  0x2d   :  { %v139_v22 = vadd.f32 %v138_v13, %v124_v12  ;;  %521 = vmatprep.mubr.bf16.mxu1 %v162_v28  ;;  %v74_v42 = vmul.f32 %v42_v18, %v42_v18  ;;  %v76_v43 = vmul.f32 %v714_v39, %v714_v39  ;;  %v130_v45 = vmul.f32 %v66_v30, %v66_v30  ;;  %v69_v51 = vld [vmem:[#allocation5 + $0x60] sm:$0xff]  ;;  %v70_v52 = vld [vmem:[#allocation5 + $0x68] sm:$0xff]  ;;  %v47_v60 = vld [vmem:[#allocation2 + $0x30] sm:$0xff]  ;;  %p634_p6 = pnand %p633_p5, %p627_p2 }
  0x2e   :  { %500 = vmatpush3.bf16.msra.mxu0 %v167_v8  ;;  %538 = vmatpush3.bf16.msra.mxu1 %v167_v8  ;;  %v131_v47 = vmul.f32 %v67_v40, %v67_v40  ;;  %v171_v48 = vpack.c.bf16 %v68_v41, %v67_v40  ;;  %v77_v53 = vmul.f32 %v718_v49, %v718_v49  ;;  %v48_v61 = vld [vmem:[#allocation2 + $0x38] sm:$0xff]  ;;  %v71_v62 = vld [vmem:[#allocation5 + $0x70] sm:$0xff] }
  0x2f   :  { %v140_v26 = vadd.f32 %v139_v22, %v125_v14  ;;  %501 = vmatprep.subr.bf16.mxu0 %v168_v15  ;;  %531 = vmatprep.subr.bf16.mxu1 %v168_v15  ;;  %v78_v54 = vmul.f32 %v720_v50, %v720_v50  ;;  %v132_v56 = vmul.f32 %v68_v41, %v68_v41  ;;  %v72_v63 = vld [vmem:[#allocation5 + $0x78] sm:$0xff]  ;;  %v51_v11 = vld [vmem:[#allocation2 + $0x50] sm:$0xff]  ;;  %v53_v14 = vld [vmem:[#allocation2 + $0x60] sm:$0xff] }
  0x30   :  { %89 = vadd.xlane.f32.xlu0 %v73_v34  ;;  %93 = vadd.xlane.f32.xlu1 %v75_v35  ;;  %v133_v58 = vmul.f32 %v69_v51, %v69_v51  ;;  %v172_v59 = vpack.c.bf16 %v70_v52, %v69_v51  ;;  %v79_v0 = vmul.f32 %v47_v60, %v47_v60  ;;  %v52_v12 = vld [vmem:[#allocation2 + $0x58] sm:$0xff]  ;;  %v55_v25 = vld [vmem:[#allocation2 + $0x70] sm:$0xff] }
  0x31   :  { %v141_v32 = vadd.f32 %v140_v26, %v126_v23  ;;  %v80_v1 = vmul.f32 %v48_v61, %v48_v61  ;;  %v134_v3 = vmul.f32 %v70_v52, %v70_v52  ;;  %v135_v5 = vmul.f32 %v71_v62, %v71_v62  ;;  %v56_v26 = vld [vmem:[#allocation2 + $0x78] sm:$0xff] }
  0x32   :  { %502 = vmatpush3.bf16.msra.mxu0 %v168_v15  ;;  %539 = vmatpush3.bf16.msra.mxu1 %v168_v15  ;;  %v173_v6 = vpack.c.bf16 %v72_v63, %v71_v62  ;;  %v81_v7 = vmul.f32 %v704_v20, %v704_v20  ;;  %v82_v8 = vmul.f32 %v706_v21, %v706_v21  ;;  %v54_v15 = vld [vmem:[#allocation2 + $0x68] sm:$0xff] }
  0x33   :  { %v142_v36 = vadd.f32 %v141_v32, %v127_v24  ;;  %503 = vmatprep.subr.bf16.mxu0 %v169_v27  ;;  %532 = vmatprep.subr.bf16.mxu1 %v169_v27  ;;  %v136_v10 = vmul.f32 %v72_v63, %v72_v63  ;;  %v83_v16 = vmul.f32 %v51_v11, %v51_v11 }
  0x34   :  { %91 = vadd.xlane.f32.xlu0 %v74_v42  ;;  %95 = vadd.xlane.f32.xlu1 %v76_v43  ;;  %v84_v17 = vmul.f32 %v52_v12, %v52_v12  ;;  %v159_v19 = vpack.c.bf16 %v714_v39, %v710_v31  ;;  %v163_v20 = vpack.c.bf16 %v52_v12, %v51_v11 }
  0x35   :  { %v143_v44 = vadd.f32 %v142_v36, %v128_v33  ;;  %v160_v21 = vpack.c.bf16 %v720_v50, %v718_v49  ;;  %v164_v22 = vpack.c.bf16 %v54_v15, %v53_v14  ;;  %v85_v23 = vmul.f32 %v53_v14, %v53_v14 }
  0x36   :  { %504 = vmatpush3.bf16.msra.mxu0 %v169_v27  ;;  %540 = vmatpush3.bf16.msra.mxu1 %v169_v27  ;;  %v86_v24 = vmul.f32 %v54_v15, %v54_v15  ;;  %v87_v27 = vmul.f32 %v55_v25, %v55_v25  ;;  %v88_v28 = vmul.f32 %v56_v26, %v56_v26 }
  0x37   :  { %v144_v46 = vadd.f32 %v143_v44, %v129_v37  ;;  %505 = vmatprep.subr.bf16.mxu0 %v170_v38  ;;  %533 = vmatprep.subr.bf16.mxu1 %v170_v38  ;;  %v161_v29 = vpack.c.bf16 %v48_v61, %v47_v60  ;;  %v165_v30 = vpack.c.bf16 %v56_v26, %v55_v25 }
  0x38   :  { %97 = vadd.xlane.f32.xlu0 %v77_v53  ;;  %99 = vadd.xlane.f32.xlu1 %v78_v54 }
  0x39   :  { %v145_v55 = vadd.f32 %v144_v46, %v130_v45 }
  0x3a   :  { %506 = vmatpush3.bf16.msra.mxu0 %v170_v38  ;;  %541 = vmatpush3.bf16.msra.mxu1 %v170_v38 }
  0x3b   :  { %v146_v57 = vadd.f32 %v145_v55, %v131_v47  ;;  %507 = vmatprep.subr.bf16.mxu0 %v171_v48  ;;  %534 = vmatprep.subr.bf16.mxu1 %v171_v48 }
  0x3c   :  { %101 = vadd.xlane.f32.xlu0 %v79_v0  ;;  %103 = vadd.xlane.f32.xlu1 %v80_v1 }
  0x3d   :  { %v147_v2 = vadd.f32 %v146_v57, %v132_v56 }
  0x3e   :  { %508 = vmatpush3.bf16.msra.mxu0 %v171_v48  ;;  %542 = vmatpush3.bf16.msra.mxu1 %v171_v48 }
  0x3f   :  { %v148_v4 = vadd.f32 %v147_v2, %v133_v58  ;;  %509 = vmatprep.subr.bf16.mxu0 %v172_v59  ;;  %535 = vmatprep.subr.bf16.mxu1 %v172_v59 }
  0x40   :  { %105 = vadd.xlane.f32.xlu0 %v81_v7  ;;  %107 = vadd.xlane.f32.xlu1 %v82_v8 }
  0x41   :  { %v149_v9 = vadd.f32 %v148_v4, %v134_v3 }
  0x42   :  { %510 = vmatpush3.bf16.msra.mxu0 %v172_v59  ;;  %543 = vmatpush3.bf16.msra.mxu1 %v172_v59 }
  0x43   :  { %v150_v13 = vadd.f32 %v149_v9, %v135_v5  ;;  %511 = vmatprep.subr.bf16.mxu0 %v173_v6  ;;  %536 = vmatprep.subr.bf16.mxu1 %v173_v6 }
  0x44   :  { %109 = vadd.xlane.f32.xlu0 %v83_v16  ;;  %111 = vadd.xlane.f32.xlu1 %v84_v17 }
  0x45   :  { %v151_v18 = vadd.f32 %v150_v13, %v136_v10 }
  0x46   :  { %512 = vmatpush3.bf16.msra.mxu0 %v173_v6  ;;  %544 = vmatpush3.bf16.msra.mxu1 %v173_v6 }
  0x47   :  { %v152_v37 = vrot.slane %v151_v18, 4 }
  0x48   :  { %113 = vadd.xlane.f32.xlu0 %v85_v23  ;;  %115 = vadd.xlane.f32.xlu1 %v86_v24 }
  0x49   :  { %514 = vmatmul.mubr.bf16.vlgmr.msra.gmra.mrb[0].mxu0 %v159_v19  ;;  %522 = vmatmul.mubr.bf16.vlgmr.msra.gmra.mrb[0].mxu1 %v163_v20  ;;  %v153_v38 = vadd.f32 %v152_v37, %v151_v18 }
  0x4a   :  { %517 = vmatprep.mubr.bf16.mxu0 %v160_v21  ;;  %525 = vmatprep.mubr.bf16.mxu1 %v164_v22 }
  0x4b   :  { %v154_v41 = vrot.slane %v153_v38, 2 }
  0x4c   :  { %117 = vadd.xlane.f32.xlu0 %v87_v27  ;;  %119 = vadd.xlane.f32.xlu1 %v88_v28 }
  0x4d   :  { %v155_v44 = vadd.f32 %v154_v41, %v153_v38 }
  0x4f   :  { %v156_v45 = vrot.slane %v155_v44, 1 }
  0x51   :  { %518 = vmatmul.mubr.bf16.gmra.mrb[4].mxu0 %v161_v29  ;;  %526 = vmatmul.mubr.bf16.gmra.mrb[4].mxu1 %v165_v30  ;;  %v157_v48 = vadd.f32 %v156_v45, %v155_v44 }
  0xbd   :  { %v90_v31 = vpop.xlane.xlu0 %89  ;;  %v94_v32 = vpop.xlane.xlu1 %93 }
  0xbe   :  { %v271_v52 = vadd.f32 %v157_v48, %v90_v31  ;;  %v273_v53 = vadd.f32 %v157_v48, %v94_v32 }
  0xc1   :  { %v92_v33 = vpop.xlane.xlu0 %91  ;;  %v96_v34 = vpop.xlane.xlu1 %95 }
  0xc2   :  { %v272_v54 = vadd.f32 %v157_v48, %v92_v33  ;;  %v274_v57 = vadd.f32 %v157_v48, %v96_v34 }
  0xc5   :  { %v98_v35 = vpop.xlane.xlu0 %97  ;;  %v100_v36 = vpop.xlane.xlu1 %99 }
  0xc6   :  { %v275_v25 = vadd.f32 %v157_v48, %v98_v35  ;;  %v743_v26 = vadd.f32 %v157_v48, %v100_v36 }
  0xc9   :  { %v102_v39 = vpop.xlane.xlu0 %101  ;;  %v104_v40 = vpop.xlane.xlu1 %103 }
  0xca   :  { %v277_v29 = vadd.f32 %v157_v48, %v102_v39  ;;  %v746_v30 = vadd.f32 %v157_v48, %v104_v40 }
  0xcd   :  { %v106_v42 = vpop.xlane.xlu0 %105  ;;  %v108_v43 = vpop.xlane.xlu1 %107 }
  0xce   :  { %v279_v63 = vadd.f32 %v157_v48, %v106_v42  ;;  %v280_v0 = vadd.f32 %v157_v48, %v108_v43 }
  0xd1   :  { %v110_v46 = vpop.xlane.xlu0 %109  ;;  %v112_v47 = vpop.xlane.xlu1 %111 }
  0xd2   :  { %v281_v49 = vadd.f32 %v157_v48, %v110_v46  ;;  %v282_v62 = vadd.f32 %v157_v48, %v112_v47 }
  0xd5   :  { %v114_v50 = vpop.xlane.xlu0 %113  ;;  %v116_v51 = vpop.xlane.xlu1 %115 }
  0xd6   :  { %v749_v31 = vadd.f32 %v157_v48, %v114_v50  ;;  %v752_v34 = vadd.f32 %v157_v48, %v116_v51 }
  0xd9   :  { %v118_v23 = vpop.xlane.xlu0 %117  ;;  %v120_v24 = vpop.xlane.xlu1 %119 }
  0xda   :  { %v285_v35 = vadd.f32 %v157_v48, %v118_v23  ;;  %v754_v37 = vadd.f32 %v157_v48, %v120_v24 }
 0x11c   :  { %v515_v55 = vpop.f32.mrb[0].mxu0  ;;  %v523_v56 = vpop.f32.mrb[0].mxu1 }
 0x11d   :  { %v289_v58 = vmul.f32 2.0, %v515_v55  ;;  %v297_v59 = vmul.f32 2.0, %v523_v56  ;;  %v208_v60 = vpop.f32.mrb[1].mxu0  ;;  %v240_v61 = vpop.f32.mrb[1].mxu1 }
 0x11e   :  { %v287_v1 = vmul.f32 2.0, %v208_v60  ;;  %v295_v2 = vmul.f32 2.0, %v240_v61  ;;  %v524_v3 = vpop.f32.mrb[2].mxu1  ;;  %v516_v4 = vpop.f32.mrb[2].mxu0 }
 0x11f   :  { %v305_v5 = vsub.f32 %v273_v53, %v289_v58  ;;  %v313_v6 = vsub.f32 %v281_v49, %v297_v59  ;;  %v298_v7 = vmul.f32 2.0, %v524_v3  ;;  %v290_v8 = vmul.f32 2.0, %v516_v4  ;;  %v211_v9 = vpop.f32.mrb[3].mxu0  ;;  %v243_v10 = vpop.f32.mrb[3].mxu1 }
 0x120   :  { %v303_v11 = vsub.f32 %v271_v52, %v287_v1  ;;  %v311_v12 = vsub.f32 %v279_v63, %v295_v2  ;;  %v288_v13 = vmul.f32 2.0, %v211_v9  ;;  %v296_v14 = vmul.f32 2.0, %v243_v10 }
 0x121   :  { %v734_v15 = vmax.f32 %v305_v5, 0.0  ;;  %v736_v16 = vmax.f32 %v313_v6, 0.0  ;;  %v314_v17 = vsub.f32 %v282_v62, %v298_v7  ;;  %v306_v18 = vsub.f32 %v274_v57, %v290_v8 }
 0x122   :  { %v738_v19 = vmax.f32 %v303_v11, 0.0  ;;  %v740_v20 = vmax.f32 %v311_v12, 0.0  ;;  %v304_v21 = vsub.f32 %v272_v54, %v288_v13  ;;  %v312_v22 = vsub.f32 %v280_v0, %v296_v14 }
 0x123   :  { %550 = vrsqrt.f32 %v734_v15  ;;  %vm351_vm0 = vcmp.eq.f32.partialorder %v734_v15, inf  ;;  %v759_v39 = vmax.f32 %v314_v17, 0.0  ;;  %v761_v40 = vmax.f32 %v306_v18, 0.0 }
 0x124   :  { %552 = vrsqrt.f32 %v736_v16  ;;  %v519_v27 = vpop.f32.mrb[4].mxu0  ;;  %v527_v28 = vpop.f32.mrb[4].mxu1  ;;  %v763_v41 = vmax.f32 %v304_v21, 0.0  ;;  %vm353_vm1 = vcmp.eq.f32.partialorder %v734_v15, 0.0  ;;  %v354_v44 = vand.u32 2147483648, %v734_v15 }
 0x125   :  { %554 = vrsqrt.f32 %v738_v19  ;;  %v224_v32 = vpop.f32.mrb[5].mxu0  ;;  %v256_v33 = vpop.f32.mrb[5].mxu1  ;;  %v771_v45 = vmax.f32 %v312_v22, 0.0  ;;  %v293_v46 = vmul.f32 2.0, %v519_v27  ;;  %v301_v47 = vmul.f32 2.0, %v527_v28 }
 0x126   :  { %556 = vrsqrt.f32 %v740_v20  ;;  %v528_v36 = vpop.f32.mrb[6].mxu1  ;;  %v756_v38 = vpop.f32.mrb[6].mxu0  ;;  %v291_v48 = vmul.f32 2.0, %v224_v32  ;;  %v299_v49 = vmul.f32 2.0, %v256_v33  ;;  %vm407_vm2 = vcmp.eq.f32.partialorder %v736_v16, inf }
 0x127   :  { %v765_v42 = vpop.f32.mrb[7].mxu0  ;;  %v767_v43 = vpop.f32.mrb[7].mxu1  ;;  %558 = vrsqrt.f32 %v759_v39  ;;  %vm409_vm3 = vcmp.eq.f32.partialorder %v736_v16, 0.0  ;;  %v410_v50 = vand.u32 2147483648, %v736_v16  ;;  %vm337_vm4 = vcmp.eq.f32.partialorder %v738_v19, inf }
 0x128   :  { %560 = vrsqrt.f32 %v761_v40  ;;  %vm339_vm5 = vcmp.eq.f32.partialorder %v738_v19, 0.0  ;;  %v340_v51 = vand.u32 2147483648, %v738_v19  ;;  %vm393_vm6 = vcmp.eq.f32.partialorder %v740_v20, inf }
 0x129   :  { %562 = vrsqrt.f32 %v763_v41  ;;  %vm395_vm7 = vcmp.eq.f32.partialorder %v740_v20, 0.0  ;;  %v396_v52 = vand.u32 2147483648, %v740_v20  ;;  %v309_v54 = vsub.f32 %v277_v29, %v293_v46 }
 0x12a   :  { %564 = vrsqrt.f32 %v771_v45  ;;  %v317_v55 = vsub.f32 %v285_v35, %v301_v47  ;;  %v307_v56 = vsub.f32 %v275_v25, %v291_v48  ;;  %v315_v57 = vsub.f32 %v749_v31, %v299_v49 }
 0x12b   :  { %vm414_vm8 = vcmp.eq.f32.partialorder %v759_v39, inf  ;;  %vm416_vm9 = vcmp.eq.f32.partialorder %v759_v39, 0.0  ;;  %v302_v60 = vmul.f32 2.0, %v528_v36  ;;  %v417_v63 = vand.u32 2147483648, %v759_v39 }
 0x12c   :  { %v792_v0 = vmax.f32 %v309_v54, 0.0  ;;  %v794_v1 = vmax.f32 %v317_v55, 0.0  ;;  %v800_v5 = vmax.f32 %v307_v56, 0.0  ;;  %vm358_vm10 = vcmp.eq.f32.partialorder %v761_v40, inf }
 0x12d   :  { %v551_v53 = vpop.eup %550  ;;  %v318_v6 = vsub.f32 %v754_v37, %v302_v60  ;;  %vm360_vm11 = vcmp.eq.f32.partialorder %v761_v40, 0.0  ;;  %v361_v21 = vand.u32 2147483648, %v761_v40  ;;  %vm344_vm12 = vcmp.eq.f32.partialorder %v763_v41, inf }
 0x12e   :  { %v553_v58 = vpop.eup %552  ;;  %v350_v59 = vmul.f32 %v551_v53, %v734_v15  ;;  %566 = vrsqrt.f32 %v792_v0  ;;  %vm346_vm13 = vcmp.eq.f32.partialorder %v763_v41, 0.0  ;;  %v347_v23 = vand.u32 2147483648, %v763_v41 }
 0x12f   :  { %v555_v61 = vpop.eup %554  ;;  %v406_v62 = vmul.f32 %v553_v58, %v736_v16  ;;  %568 = vrsqrt.f32 %v794_v1  ;;  %v294_v27 = vmul.f32 2.0, %v756_v38  ;;  %v292_v28 = vmul.f32 2.0, %v765_v42 }
 0x130   :  { %v557_v2 = vpop.eup %556  ;;  %v352_v3 = vsel %vm351_vm0, %v734_v15, %v350_v59  ;;  %v336_v4 = vmul.f32 %v555_v61, %v738_v19  ;;  %v823_v15 = vmax.f32 %v315_v57, 0.0  ;;  %570 = vrsqrt.f32 %v800_v5 }
 0x131   :  { %v355_v7 = vsel %vm353_vm1, %v354_v44, %v352_v3  ;;  %v408_v8 = vsel %vm407_vm2, %v736_v16, %v406_v62  ;;  %v392_v9 = vmul.f32 %v557_v2, %v740_v20  ;;  %v559_v12 = vpop.eup %558  ;;  %vm400_vm14 = vcmp.eq.f32.partialorder %v771_v45, inf }
 0x132   :  { %449 = vst [vmem:[#allocation7 + $0x10] sm:$0xff] %v355_v7  ;;  %v411_v10 = vsel %vm409_vm3, %v410_v50, %v408_v8  ;;  %v338_v11 = vsel %vm337_vm4, %v738_v19, %v336_v4  ;;  %v561_v16 = vpop.eup %560  ;;  %v413_v18 = vmul.f32 %v559_v12, %v759_v39  ;;  %572 = vrsqrt.f32 %v823_v15 }
 0x133   :  { %457 = vst [vmem:[#allocation7 + $0x50] sm:$0xff] %v411_v10  ;;  %v341_v13 = vsel %vm339_vm5, %v340_v51, %v338_v11  ;;  %v394_v14 = vsel %vm393_vm6, %v740_v20, %v392_v9  ;;  %v563_v19 = vpop.eup %562  ;;  %v357_v22 = vmul.f32 %v561_v16, %v761_v40  ;;  %v403_v36 = vand.u32 2147483648, %v771_v45 }
 0x134   :  { %447 = vst [vmem:[#allocation7] sm:$0xff] %v341_v13  ;;  %v397_v17 = vsel %vm395_vm7, %v396_v52, %v394_v14  ;;  %v565_v24 = vpop.eup %564  ;;  %v415_v20 = vsel %vm414_vm8, %v759_v39, %v413_v18  ;;  %v343_v25 = vmul.f32 %v563_v19, %v763_v41  ;;  %vm402_vm15 = vcmp.eq.f32.partialorder %v771_v45, 0.0 }
 0x135   :  { %455 = vst [vmem:[#allocation7 + $0x40] sm:$0xff] %v397_v17  ;;  %v418_v29 = vsel %vm416_vm9, %v417_v63, %v415_v20  ;;  %v359_v31 = vsel %vm358_vm10, %v761_v40, %v357_v22  ;;  %v399_v32 = vmul.f32 %v565_v24, %v771_v45  ;;  %v334_v39 = vmax.f32 %v318_v6, 0.0 }
 0x136   :  { %458 = vst [vmem:[#allocation7 + $0x58] sm:$0xff] %v418_v29  ;;  %v362_v33 = vsel %vm360_vm11, %v361_v21, %v359_v31  ;;  %v345_v35 = vsel %vm344_vm12, %v763_v41, %v343_v25  ;;  %v310_v42 = vsub.f32 %v746_v30, %v294_v27  ;;  %v308_v44 = vsub.f32 %v743_v26, %v292_v28 }
 0x137   :  { %450 = vst [vmem:[#allocation7 + $0x18] sm:$0xff] %v362_v33  ;;  %v348_v37 = vsel %vm346_vm13, %v347_v23, %v345_v35  ;;  %v401_v38 = vsel %vm400_vm14, %v771_v45, %v399_v32  ;;  %v300_v46 = vmul.f32 2.0, %v767_v43  ;;  %574 = vrsqrt.f32 %v334_v39 }
 0x138   :  { %448 = vst [vmem:[#allocation7 + $0x8] sm:$0xff] %v348_v37  ;;  %v404_v40 = vsel %vm402_vm15, %v403_v36, %v401_v38  ;;  %v567_v47 = vpop.eup %566  ;;  %v326_v41 = vmax.f32 %v310_v42, 0.0  ;;  %v324_v49 = vmax.f32 %v308_v44, 0.0  ;;  %vm379_vm0 = vcmp.eq.f32.partialorder %v792_v0, inf }
 0x139   :  { %456 = vst [vmem:[#allocation7 + $0x48] sm:$0xff] %v404_v40  ;;  %v378_v48 = vmul.f32 %v567_v47, %v792_v0  ;;  %v316_v50 = vsub.f32 %v752_v34, %v300_v46  ;;  %v569_v51 = vpop.eup %568  ;;  %v382_v45 = vand.u32 2147483648, %v792_v0  ;;  %vm381_vm1 = vcmp.eq.f32.partialorder %v792_v0, 0.0 }
 0x13a   :  { %v434_v26 = vmul.f32 %v569_v51, %v794_v1  ;;  %576 = vrsqrt.f32 %v326_v41  ;;  %v571_v43 = vpop.eup %570  ;;  %vm435_vm2 = vcmp.eq.f32.partialorder %v794_v1, inf  ;;  %v438_v53 = vand.u32 2147483648, %v794_v1 }
 0x13b   :  { %v380_v30 = vsel %vm379_vm0, %v792_v0, %v378_v48  ;;  %578 = vrsqrt.f32 %v324_v49  ;;  %vm437_vm3 = vcmp.eq.f32.partialorder %v794_v1, 0.0  ;;  %v364_v54 = vmul.f32 %v571_v43, %v800_v5 }
 0x13c   :  { %v383_v52 = vsel %vm381_vm1, %v382_v45, %v380_v30  ;;  %v436_v34 = vsel %vm435_vm2, %v794_v1, %v434_v26  ;;  %v573_v55 = vpop.eup %572  ;;  %vm365_vm4 = vcmp.eq.f32.partialorder %v800_v5, inf  ;;  %v368_v57 = vand.u32 2147483648, %v800_v5 }
 0x13d   :  { %453 = vst [vmem:[#allocation7 + $0x30] sm:$0xff] %v383_v52  ;;  %v439_v56 = vsel %vm437_vm3, %v438_v53, %v436_v34  ;;  %v332_v58 = vmax.f32 %v316_v50, 0.0  ;;  %v366_v59 = vsel %vm365_vm4, %v800_v5, %v364_v54  ;;  %vm367_vm5 = vcmp.eq.f32.partialorder %v800_v5, 0.0 }
 0x13e   :  { %461 = vst [vmem:[#allocation7 + $0x70] sm:$0xff] %v439_v56  ;;  %v420_v60 = vmul.f32 %v573_v55, %v823_v15  ;;  %v369_v61 = vsel %vm367_vm5, %v368_v57, %v366_v59  ;;  %vm421_vm6 = vcmp.eq.f32.partialorder %v823_v15, inf  ;;  %v424_v62 = vand.u32 2147483648, %v823_v15 }
 0x13f   :  { %580 = vrsqrt.f32 %v332_v58  ;;  %451 = vst [vmem:[#allocation7 + $0x20] sm:$0xff] %v369_v61  ;;  %vm423_vm7 = vcmp.eq.f32.partialorder %v823_v15, 0.0  ;;  %vm442_vm8 = vcmp.eq.f32.partialorder %v334_v39, inf  ;;  %v445_v3 = vand.u32 2147483648, %v334_v39 }
 0x140   :  { %v422_v63 = vsel %vm421_vm6, %v823_v15, %v420_v60  ;;  %vm444_vm9 = vcmp.eq.f32.partialorder %v334_v39, 0.0  ;;  %vm386_vm10 = vcmp.eq.f32.partialorder %v326_v41, inf  ;;  %v389_v9 = vand.u32 2147483648, %v326_v41 }
 0x141   :  { %v575_v0 = vpop.eup %574  ;;  %v425_v1 = vsel %vm423_vm7, %v424_v62, %v422_v63  ;;  %vm388_vm11 = vcmp.eq.f32.partialorder %v326_v41, 0.0  ;;  %vm372_vm12 = vcmp.eq.f32.partialorder %v324_v49, inf  ;;  %v375_v12 = vand.u32 2147483648, %v324_v49 }
 0x142   :  { %459 = vst [vmem:[#allocation7 + $0x60] sm:$0xff] %v425_v1  ;;  %v441_v2 = vmul.f32 %v575_v0, %v334_v39  ;;  %vm374_vm13 = vcmp.eq.f32.partialorder %v324_v49, 0.0  ;;  %vm428_vm14 = vcmp.eq.f32.partialorder %v332_v58, inf  ;;  %v431_v18 = vand.u32 2147483648, %v332_v58 }
 0x143   :  { %vm430_vm15 = vcmp.eq.f32.partialorder %v332_v58, 0.0 }
 0x144   :  { %v577_v4 = vpop.eup %576  ;;  %v443_v5 = vsel %vm442_vm8, %v334_v39, %v441_v2 }
 0x145   :  { %v579_v6 = vpop.eup %578  ;;  %v446_v7 = vsel %vm444_vm9, %v445_v3, %v443_v5  ;;  %v385_v8 = vmul.f32 %v577_v4, %v326_v41 }
 0x146   :  { %462 = vst [vmem:[#allocation7 + $0x78] sm:$0xff] %v446_v7  ;;  %v371_v10 = vmul.f32 %v579_v6, %v324_v49 }
 0x147   :  { %v387_v11 = vsel %vm386_vm10, %v326_v41, %v385_v8 }
 0x148   :  { %v390_v13 = vsel %vm388_vm11, %v389_v9, %v387_v11  ;;  %v373_v14 = vsel %vm372_vm12, %v324_v49, %v371_v10 }
 0x149   :  { %v581_v15 = vpop.eup %580  ;;  %454 = vst [vmem:[#allocation7 + $0x38] sm:$0xff] %v390_v13  ;;  %v376_v16 = vsel %vm374_vm13, %v375_v12, %v373_v14 }
 0x14a   :  { %452 = vst [vmem:[#allocation7 + $0x28] sm:$0xff] %v376_v16  ;;  %v427_v17 = vmul.f32 %v581_v15, %v332_v58 }
 0x14c   :  { %v429_v21 = vsel %vm428_vm14, %v332_v58, %v427_v17 }
 0x14d   :  { %v432_v19 = vsel %vm430_vm15, %v431_v18, %v429_v21 }
 0x14e   :  { %460 = vst [vmem:[#allocation7 + $0x68] sm:$0xff] %v432_v19 }
 0x14f   :  { %637 = shalt.err (!%p634_p6)
}
 0x150   :  { %s638_s10 = scalar_lea.hbm %s899_s2, 2048 }
 0x151   :  { %p639_p7 = scmp.ne.s32.totalorder %s899_s2, %s638_s10  ;;  %p642_p8 = scmp.lt.u32.totalorder %s638_s10, %s899_s2 }
 0x153   :  { %p644_p9 = pnand %p642_p8, %p639_p7 }
 0x155   :  { %647 = shalt.err (!%p644_p9)
}
 0x156   :  { %474 = dma.vmem_to_hbm [thread:$0]  %s469_s6, 2048, %s899_s2, [#allocation4], %s655_s19, %s655_s19, %s656_s20  }
 0x157   :  { %652 = dma.done.wait [#allocation4], 2048  }
 0x158   :  { %653 = vsyncadd [#allocation4], 4294965248 }
 0x159   :  { %478 = vsyncpa [#allocation3], 1 }
 0x15a   :  { %479 = vsyncpa [#allocation6], 1 }
 0x15b   :  { %480 = vsyncpa [#allocation4], 1 }

</bundles_post_ra>
